<compile_context>
chip_gen: v7x
topology: tpu7x:2x2x1
jax: 0.10.0
libtpu: 0.0.40
codegen_flags: <defaults>
</compile_context>

<pallas_src>
import functools

import jax
import jax.numpy as jnp
from jax.experimental import pallas as pl
from jax.experimental.pallas import tpu as pltpu


_LANE = 128
_MIB = 1024 * 1024


def _round_up(x: int, m: int) -> int:
    return (x + m - 1) // m * m


def _vmem_capacity_bytes() -> int:
    """Per-core VMEM capacity; conservative fallback = v7x's 64 MiB per TC."""
    try:
        cap = getattr(pltpu.get_tpu_info(), "vmem_capacity_bytes", None)
        if cap:
            return int(cap)
    except Exception:
        pass
    return 64 * _MIB


def _choose_tiles(m: int, k: int, e: int, cbytes: int, obytes: int,
                  vmem_budget: int, max_tile_m: int):
    """Pick (tm, te): M tile (multiple of 256 where possible) and E tile."""
    # E tile: keep the whole [K, E] weight resident unless it would eat too much
    # VMEM (large-E embeddings); then tile E in 128-lane multiples (never tile K,
    # so no accumulator scratch / reduction axis is needed).
    weight_budget = max(vmem_budget // 4, 2 * _MIB)
    if e <= _LANE or k * e * cbytes <= weight_budget:
        te = e
    else:
        te = (weight_budget // (k * cbytes)) // _LANE * _LANE
        te = int(min(max(te, _LANE), e))

    def working_set(tm: int) -> int:
        return (2 * tm * k * cbytes        # double-buffered activation tile
                + 2 * tm * te * obytes     # double-buffered output tile
                + tm * te * 4              # f32 accumulator temporary
                + k * te * cbytes          # resident weight (single-buffered)
                + te * 4                   # f32 bias
                + _MIB)                    # slack for Mosaic internal scratch

    tm = max_tile_m
    while tm > 256 and working_set(tm) > vmem_budget:
        tm //= 2

    if m % 8 != 0:
        tm = m                      # block sublane dim must be mult-of-8 or full extent
    else:
        tm = min(tm, m)
        if tm >= m and m >= 16:
            # Expose >= 2 M-blocks so multi-TC parts (v7x) can shard the parallel axis.
            tm = _round_up(pl.cdiv(m, 2), 8)
    return int(tm), int(te)


def _patch_embed_kernel(x_ref, w_ref, b_ref, o_ref):
    # x_ref: [tm, K] compute dtype (streamed); w_ref: [K, te] (resident);
    # b_ref: [1, te] f32 (resident); o_ref: [tm, te] out dtype.
    acc = jnp.dot(x_ref[...], w_ref[...], preferred_element_type=jnp.float32)
    o_ref[...] = (acc + b_ref[...]).astype(o_ref.dtype)


def global_patch_embedding(x, weight, bias, *, patch_size,
                           compute_dtype=jnp.bfloat16, out_dtype=None):
    """Forward of GlobalPatchEmbedding.

    x: [B, C, H, W]; weight: [E, C, p, p]; bias: [E]  ->  [B, H//p, W//p, E]

    compute_dtype: MXU operand dtype (bf16 default; pass jnp.float32 for exact
        f32-conv parity).  out_dtype: output dtype (default x.dtype, matching the
        PyTorch module; pass jnp.bfloat16 to halve the output HBM stream).
    """
    B, C, H, W = x.shape
    p = patch_size
    if H % p != 0 or W % p != 0:
        raise ValueError(
            f"GlobalPatchEmbedding requires H % patch_size == 0 and W % patch_size == 0, "
            f"got H={H}, W={W}, patch_size={p}"
        )
    dH, dW = H // p, W // p
    E = weight.shape[0]
    K = C * p * p
    M = B * dH * dW
    out_dtype = x.dtype if out_dtype is None else out_dtype
    cbytes = jnp.dtype(compute_dtype).itemsize
    obytes = jnp.dtype(out_dtype).itemsize

    # Patch gather: x[b, c, kh*dH+oh, kw*dW+ow] -> xp[(b,oh,ow), (c,kh,kw)].
    # Cast-then-transpose lets XLA fuse this into one read-f32 / write-bf16 pass.
    xr = x.astype(compute_dtype).reshape(B, C, p, dH, p, dW)   # [b, c, kh, oh, kw, ow]
    xp = xr.transpose(0, 3, 5, 1, 2, 4).reshape(M, K)          # [b, oh, ow | c, kh, kw]

    wf = weight.reshape(E, K).T.astype(compute_dtype)          # [K, E]
    bf = bias.astype(jnp.float32).reshape(1, E)                # [1, E]

    # Hardware-derived VMEM sizing (per-core aware; headroom for Mosaic scratch).
    vmem_cap = _vmem_capacity_bytes()
    vmem_limit = min(int(0.75 * vmem_cap), vmem_cap - 16 * _MIB)
    vmem_budget = max(vmem_limit - 16 * _MIB, 16 * _MIB)
    max_tile_m = 2048 if vmem_cap >= 100 * _MIB else 1024

    tm, te = _choose_tiles(M, K, E, cbytes, obytes, vmem_budget, max_tile_m)
    grid_m = pl.cdiv(M, tm)
    grid_e = pl.cdiv(E, te)

    cost = pl.CostEstimate(
        flops=2 * M * K * E,
        transcendentals=0,
        bytes_accessed=M * K * cbytes + K * E * cbytes + E * 4 + M * E * obytes,
    )

    if grid_e == 1:
        # Common case: whole [K, E] weight + bias resident (single-buffered),
        # activation/output tiles stream over the M axis.
        grid = (grid_m,)
        in_specs = [
            pl.BlockSpec((tm, K), lambda i: (i, 0)),
            pl.BlockSpec((K, E), lambda i: (0, 0),
                         pipeline_mode=pl.Buffered(buffer_count=1)),
            pl.BlockSpec((1, E), lambda i: (0, 0),
                         pipeline_mode=pl.Buffered(buffer_count=1)),
        ]
        out_spec = pl.BlockSpec((tm, E), lambda i: (i, 0))
        dim_sem = ("parallel",)
    else:
        # Large-E fallback: tile E (outer axis, so each weight slice stays resident
        # across the inner M sweep); default double-buffering on the changing blocks.
        grid = (grid_e, grid_m)
        in_specs = [
            pl.BlockSpec((tm, K), lambda j, i: (i, 0)),
            pl.BlockSpec((K, te), lambda j, i: (0, j)),
            pl.BlockSpec((1, te), lambda j, i: (0, j)),
        ]
        out_spec = pl.BlockSpec((tm, te), lambda j, i: (i, j))
        dim_sem = ("parallel", "parallel")

    out = pl.pallas_call(
        _patch_embed_kernel,
        out_shape=jax.ShapeDtypeStruct((M, E), out_dtype),
        grid=grid,
        in_specs=in_specs,
        out_specs=out_spec,
        compiler_params=pltpu.CompilerParams(
            dimension_semantics=dim_sem,
            vmem_limit_bytes=vmem_limit,
        ),
        cost_estimate=cost,
    )(xp, wf, bf)

    # Free reshape (leading-dim split): [M, E] -> [B, dH, dW, E].
    return out.reshape(B, dH, dW, E)


def _reference(x, weight, bias, patch_size):
    """Plain-JAX f32 reference of the dilated-conv forward (for verification)."""
    B, C, H, W = x.shape
    p = patch_size
    dH, dW = H // p, W // p
    xr = x.reshape(B, C, p, dH, p, dW)
    # y[b, oh, ow, e] = sum_{c,kh,kw} xr[b,c,kh,oh,kw,ow] * W[e,c,kh,kw] + b[e]
    y = jnp.einsum("bchikj,echk->bije", xr, weight) + bias
    return y.astype(x.dtype)


if __name__ == "__main__":
    # Small shapes: B=2, C=4, H=W=16, patch_size=4, embedding_dim=32
    B, C, H, W = 2, 4, 16, 16
    patch_size = 4
    embedding_dim = 32

    key = jax.random.PRNGKey(0)
    kx, kw, kb = jax.random.split(key, 3)

    x = jax.random.normal(kx, (B, C, H, W), dtype=jnp.float32)
    weight = 0.02 * jax.random.normal(
        kw, (embedding_dim, C, patch_size, patch_size), dtype=jnp.float32
    )
    bias = 0.01 * jax.random.normal(kb, (embedding_dim,), dtype=jnp.float32)

    fwd = jax.jit(functools.partial(global_patch_embedding, patch_size=patch_size))
    out = jax.block_until_ready(fwd(x, weight, bias))

    ref = _reference(x, weight, bias, patch_size)
    assert out.shape == (B, H // patch_size, W // patch_size, embedding_dim), out.shape
    assert out.dtype == x.dtype, out.dtype
    # bf16 MXU operands with f32 accumulation: compare against the f32 reference with
    # a tolerance covering bf16 input quantization (~2^-8 relative).
    max_err = float(jnp.max(jnp.abs(out.astype(jnp.float32) - ref.astype(jnp.float32))))
    assert max_err < 2e-2, max_err

    print("KERNEL_OK")
</pallas_src>

<mosaic_0001>
module attributes {stable_mosaic.version = 11 : i64} {
  func.func @_patch_embed_kernel(%arg0: i32, %arg1: memref<16x64xbf16, #tpu.memory_space<vmem>>, %arg2: memref<64x32xbf16, #tpu.memory_space<vmem>>, %arg3: memref<1x32xf32, #tpu.memory_space<vmem>>, %arg4: memref<16x32xf32, #tpu.memory_space<vmem>>) attributes {dimension_semantics = [#tpu.dimension_semantics<parallel>], iteration_bounds = array<i64: 2>, scalar_prefetch = 0 : i64, scratch_operands = 0 : i64, tpu.core_type = #tpu.core_type<tc>, window_params = [{transform_indices = @transform_0, window_bounds = array<i64: 16, 64>}, {pipeline_mode = #tpu.pipeline_mode<synchronous>, transform_indices = @transform_1, window_bounds = array<i64: 64, 32>}, {pipeline_mode = #tpu.pipeline_mode<synchronous>, transform_indices = @transform_2, window_bounds = array<i64: 1, 32>}, {transform_indices = @transform_3, window_bounds = array<i64: 16, 32>}]} {
    %c0 = arith.constant 0 : index
    %c0_0 = arith.constant 0 : index
    %0 = vector.load %arg1[%c0, %c0_0] : memref<16x64xbf16, #tpu.memory_space<vmem>>, vector<16x64xbf16>
    %c0_1 = arith.constant 0 : index
    %c0_2 = arith.constant 0 : index
    %1 = vector.load %arg2[%c0_1, %c0_2] : memref<64x32xbf16, #tpu.memory_space<vmem>>, vector<64x32xbf16>
    %cst = arith.constant dense<0.000000e+00> : vector<16x32xf32>
    %2 = tpu.matmul %0, %1, %cst {dimension_numbers = #tpu.dot_dimension_numbers<[1], [0], [0], [1], [0, 0, 1, 1], [], []>} : vector<16x64xbf16>, vector<64x32xbf16>, vector<16x32xf32> -> vector<16x32xf32>
    %c0_3 = arith.constant 0 : index
    %c0_4 = arith.constant 0 : index
    %3 = vector.load %arg3[%c0_3, %c0_4] : memref<1x32xf32, #tpu.memory_space<vmem>>, vector<1x32xf32>
    %4 = vector.broadcast %3 : vector<1x32xf32> to vector<16x32xf32>
    %5 = arith.addf %2, %4 : vector<16x32xf32>
    %c0_5 = arith.constant 0 : index
    %c0_6 = arith.constant 0 : index
    %6 = vector.load %arg4[%c0_5, %c0_6] : memref<16x32xf32, #tpu.memory_space<vmem>>, vector<16x32xf32>
    tpu.vector_store %arg4[%c0_5, %c0_6], %5 {strides = array<i32>} : memref<16x32xf32, #tpu.memory_space<vmem>>, vector<16x32xf32>,
    return
  }
  func.func @transform_0(%arg0: i32) -> (i32, i32) {
    %c0_i32 = arith.constant 0 : i32
    %c0_i32_0 = arith.constant 0 : i32
    return %arg0, %c0_i32 : i32, i32
  }
  func.func @transform_1(%arg0: i32) -> (i32, i32) {
    %c0_i32 = arith.constant 0 : i32
    %c0_i32_0 = arith.constant 0 : i32
    %c0_i32_1 = arith.constant 0 : i32
    return %c0_i32, %c0_i32_0 : i32, i32
  }
  func.func @transform_2(%arg0: i32) -> (i32, i32) {
    %c0_i32 = arith.constant 0 : i32
    %c0_i32_0 = arith.constant 0 : i32
    %c0_i32_1 = arith.constant 0 : i32
    return %c0_i32, %c0_i32_0 : i32, i32
  }
  func.func @transform_3(%arg0: i32) -> (i32, i32) {
    %c0_i32 = arith.constant 0 : i32
    %c0_i32_0 = arith.constant 0 : i32
    return %arg0, %c0_i32 : i32, i32
  }
}

</mosaic_0001>

<bundles_post_ra>
// kernel: global_patch_embedding.1
= control target key start
LH: loop header
LB: loop body
LE: loop exit
PB: predicated region body
PF: predicated region fallthrough
CT: control target
= control target key end

     0   :  { %8 = vsyncpa [#allocation3], 0  ;;  %s634_s0 = inlined_call_operand.vmem [shape: bf16[32,64], index: 0, kind: input, shape index: {}]   ;;  %s635_s1 = inlined_call_operand.vmem [shape: bf16[64,32], index: 1, kind: input, shape index: {}]   ;;  %s636_s2 = inlined_call_operand.vmem [shape: f32[1,32], index: 2, kind: input, shape index: {}]   ;;  %s637_s3 = inlined_call_operand.hbm [shape: f32[32,32], index: 3, kind: output, shape index: {}]  }
   0x1   :  { %10 = vsyncpa [#allocation3 + $0x1], 0  ;;  %s517_s12 = smov 0   ;;  %s519_s13 = smov 0  }
   0x2   :  { %s521_s14 = smov 0   ;;  %s523_s15 = smov 0  }
   0x3 LB: > { %s538_s16 = sadd.s32 4294967295, %s490_s15   ;;  %s343_s17 = sadd.s32 4294967294, %s490_s15   ;;  %s490_s15 = sphi %s523_s15, %s643_s15   ;;  %s486_s14 = sphi %s521_s14, %s642_s14   ;;  %s482_s13 = sphi %s519_s13, %s641_s13   ;;  %s478_s12 = sphi %s517_s12, %s640_s12  }
   0x4   : > { %s542_s18 = sadd.s32 1, %s490_s15   ;;  %s91_s19 = sadd.s32 1, %s486_s14 }
   0x5   : > { %s88_s20 = ssub.s32 %s490_s15, %s542_s18  ;;  %p101_p0 = scmp.ne.s32.totalorder %s486_s14, %s482_s13 }
   0x6   : > { %p89_p1 = scmp.eq.s32.totalorder %s88_s20, 0  ;;  %p102_p2 = scmp.eq.s32.totalorder %s538_s16, 1 }
   0x7   : > { %p107_p3 = scmp.ne.s32.totalorder %s482_s13, %s478_s12  ;;  %p108_p4 = scmp.eq.s32.totalorder %s343_s17, 1 }
   0x8   : > { %s553_s21 = scalar_select %p89_p1, %s486_s14, %s91_s19  }
   0x9   : > { %p555_p5 = por %p102_p2, %p101_p0  ;;  %p559_p6 = por %p108_p4, %p107_p3 }
   0xa   : > { %p346_p7 = scmp.ge.s32.totalorder %s490_s15, 1  ;;  %p141_p8 = scmp.lt.s32.totalorder %s490_s15, 3 }
   0xc   : > { %p142_p9 = pnand %p346_p7, %p141_p8 }
   0xd   : > { %v423_v0 = vld [vmem:[%s635_s1] sm:$0xff] (!%p142_p9)   ;;  %v492_v1 = vmov (!%p142_p9), 0.0   ;;  %v424_v2 = vld [vmem:[%s635_s1 + $0x8] sm:$0xff] (!%p142_p9)   ;;  %vm493_vm0 = vmmov (!%p142_p9), 0   ;;  %s348_s28 = sshll.u32 (!%p142_p9), %s538_s16, 1  ;;  %v425_v3 = vld [vmem:[%s635_s1 + $0x10] sm:$0xff] (!%p142_p9)  }
   0xe   : > { %145 = sbr.rel (%p142_p9) target bundleno = 261 (0x105), region = 32  ;;  %368 = vmatprep.subr.bf16.mxu0 (!%p142_p9), %v492_v1  ;;  %376 = vmatprep.mubr.msk.bf16.mxu0 (!%p142_p9), %vm493_vm0, %v492_v1  ;;  %p166_p10 = scmp.lt.s32.totalorder (!%p142_p9), %s348_s28, 3  ;;  %v426_v4 = vld [vmem:[%s635_s1 + $0x18] sm:$0xff] (!%p142_p9)   ;;  %vm219_vm1 = vcmask (!%p142_p9), 523264   ;;  %v350_v6 = vld [vmem:[%s636_s2] ss:$0 sm:$0xff] (!%p142_p9) }
   0xf   : > { %369 = vmatpush3.bf16.msra.mxu0 (!%p142_p9), %v423_v0  ;;  %s162_s10 = sand.u32 (!%p142_p9), 1, %s482_s13   ;;  %s362_s25 = sshll.u32 (!%p142_p9), %s538_s16, 8  ;;  %vm264_vm2 = vcmask (!%p142_p9), 261120  }
  0x10   : > { %370 = vmatprep.subr.bf16.mxu0 (!%p142_p9), %v492_v1  ;;  %s347_s11 = sshll.u32 (!%p142_p9), %s162_s10, 4  ;;  %s593_s16 = scalar_lea.sflag (!%p142_p9), [#allocation3], %s162_s10 }
  0x11   : > { %s164_s20 = scalar_lea.vmem (!%p142_p9), [#allocation2], %s347_s11  ;;  %s494_s30 = smov (!%p142_p9), [#allocation2]  }
  0x12   : > { %s281_s24 = sshll.u32 (!%p142_p9), %s164_s20, 4  ;;  %s586_s24 = int_to_ptr.vmem [resolvable:$true] %s281_s24 }
  0x13   : > { %371 = vmatpush3.bf16.msra.mxu0 (!%p142_p9), %v424_v2  ;;  %s428_s29 = scalar_lea.vmem (!%p142_p9), %s586_s24, 256 }
  0x14   : > { %372 = vmatprep.subr.bf16.mxu0 (!%p142_p9), %v492_v1  ;;  %p429_p11 = scmp.ne.s32.totalorder (!%p142_p9), %s586_s24, %s428_s29 }
  0x15   : > { %s645_s28 = smov (!%p166_p10, %s348_s28), 3 }
  0x16   : > { %s349_s4 = sshll.u32 %s645_s28, 2  ;;  %s591_s28 = scalar_lea.hbm %s637_s3, %s362_s25 }
  0x17   : > { %s169_s7 = scalar_lea.vmem %s634_s0, %s349_s4  ;;  %373 = vmatpush3.bf16.msra.mxu0 %v425_v3  ;;  %p430_p12 = pnand %p429_p11, %p555_p5 }
  0x18   : > { %374 = vmatprep.subr.bf16.mxu0 %v492_v1  ;;  %v427_v5 = vld [vmem:[%s169_s7] sm:$0xff]   ;;  %s432_s4 = sshll.u32 %s494_s30, 4  ;;  %s433_s4 = int_to_ptr.vmem [resolvable:$false] %s432_s4 }
  0x19   : > { %p431_p13 = pneg %p430_p12  ;;  %s434_s5 = scalar_lea.vmem %s433_s4, 512 }
  0x1a   : > { %p435_p0 = scmp.lt.s32.totalorder %s586_s24, %s433_s4  ;;  %p436_p1 = scmp.lt.s32.totalorder %s434_s5, %s428_s29 }
  0x1b   : > { %375 = vmatpush3.bf16.msra.mxu0 %v426_v4 }
  0x1c   : > { %p437_p2 = por %p436_p1, %p435_p0 }
  0x1e   : > { %377 = vmatmul.mubr.msk.bf16.vlgmr.msra.gmra.mrb[0].mxu0 %vm219_vm1, %v427_v5  ;;  %p438_p3 = pnand %p437_p2, %p431_p13 }
  0xf1   : > { %v257_v7 = vpop.f32.mrb[0].mxu0 }
  0xf2   : > { %v258_v8 = vadd.f32 %v350_v6, %v257_v7  ;;  %v378_v9 = vpop.f32.mrb[1].mxu0 }
  0xf3   : > { %v260_v10 = vpop.f32.mrb[2].mxu0 }
  0xf4   : > { %265 = vst.msk [vmem:[%s164_s20] sm:$0xff] %vm264_vm2, %v258_v8  ;;  %v261_v11 = vadd.f32 %v350_v6, %v260_v10  ;;  %v379_v12 = vpop.f32.mrb[3].mxu0 }
  0xf6   : > { %266 = vst.msk [vmem:[%s164_s20 + $0x8] sm:$0xff] %vm264_vm2, %v261_v11 }
  0xf7   : > { %441 = shalt.err (!%p438_p3)
}
  0xf8   : > { %s442_s6 = scalar_lea.hbm %s591_s28, 256  ;;  %s446_s9 = scalar_lea.hbm %s637_s3, 512 }
  0xf9   : > { %p443_p4 = scmp.ne.s32.totalorder %s591_s28, %s442_s6  ;;  %p447_p9 = scmp.lt.u32.totalorder %s591_s28, %s637_s3 }
  0xfa   : > { %p448_p10 = scmp.lt.u32.totalorder %s446_s9, %s442_s6  ;;  %p450_p12 = scmp.lt.u32.totalorder %s442_s6, %s591_s28 }
  0xfb   : > { %p444_p7 = pnand %p443_p4, %p555_p5 }
  0xfc   : > { %p449_p11 = por %p448_p10, %p447_p9 }
  0xfd   : > { %p445_p8 = pneg %p444_p7 }
  0xfe   : > { %p451_p13 = por %p450_p12, %p449_p11 }
 0x100   : > { %p452_p0 = pnand %p451_p13, %p445_p8 }
 0x102   : > { %455 = shalt.err (!%p452_p0)
}
 0x103   : > { %s495_s17 = smov 128   ;;  %s496_s19 = smov 8  }
 0x104   : > { %380 = dma.vmem_to_hbm [thread:$0]  (%p555_p5), %s586_s24, 256, %s591_s28, %s593_s16, %s495_s17, %s495_s17, %s496_s19  }
 0x105 PF: > { %p386_p1 = scmp.ge.s32.totalorder %s490_s15, 2  ;;  %s296_s20 = sand.u32 1, %s478_s12  }
 0x106   : > { %s297_s25 = scalar_lea.sflag [#allocation3], %s296_s20 }
 0x107   : > { %p383_p2 = pnand %p386_p1, %p559_p6 }
 0x109   : > { %473 = dma.done.wait (!%p383_p2), %s297_s25, 256  }
 0x10a   : > { %475 = vsyncadd (!%p383_p2), %s297_s25, 4294967040  ;;  %p13_p3 = scmp.ge.s32.totalorder %s542_s18, 4   ;;  %s640_s12 = smov %s482_s13 }
 0x10b   : > { %s641_s13 = smov %s486_s14  ;;  %s642_s14 = smov %s553_s21 }
 0x10c   : > { %s643_s15 = smov %s542_s18  ;;  %15 = sbr.rel (!%p13_p3) target bundleno = 3 (0x3), region = 67 }
 0x113   :  { %302 = vsyncpa [#allocation3], 1 }
 0x114   :  { %304 = vsyncpa [#allocation3 + $0x1], 1 }

</bundles_post_ra>
